<compile_context>
chip_gen: v6e
topology: v6e:2x2x1
jax: 0.10.0
libtpu: 0.0.40
codegen_flags: <defaults>
</compile_context>

<pallas_src>
import functools

import jax
import jax.numpy as jnp
from jax import lax
from jax.experimental import pallas as pl
from jax.experimental.pallas import tpu as pltpu


# ---------------------------------------------------------------------------
# Hardware / sizing helpers
# ---------------------------------------------------------------------------
def _tpu_hw_params():
    """Return (physical VMEM bytes, #TensorCores-per-chip heuristic)."""
    vmem_cap = 64 << 20                      # conservative default (v7x minimum)
    try:
        info = pltpu.get_tpu_info()
        vmem_cap = int(getattr(info, "vmem_capacity_bytes", vmem_cap))
    except Exception:
        pass
    num_tc = 1
    try:
        kind = jax.devices()[0].device_kind.lower()
        if "v7" in kind or "7x" in kind:     # only listed generation with 2 TCs/chip
            num_tc = 2
    except Exception:
        pass
    return vmem_cap, num_tc


def _pick_spatial_chunk(hw, target=1024):
    """Largest multiple-of-128 divisor of hw that is <= target, else hw itself.

    Multiple-of-128 chunks keep dynamic lane slices aligned; when no such
    divisor exists (odd spatial sizes) we fall back to a single whole chunk.
    """
    if hw <= target:
        return hw
    best = 0
    c = 128
    while c <= target:
        if hw % c == 0:
            best = c
        c += 128
    return best if best else hw


def _pick_batch_block(n, nb_max, want_even_grid):
    """Largest nb <= nb_max; on 2-TC chips prefer an even number of grid steps."""
    nb = max(1, min(n, nb_max))
    if not want_even_grid or n <= 1:
        return nb
    for cand in range(nb, 0, -1):
        if pl.cdiv(n, cand) % 2 == 0:
            return cand
    return nb


# ---------------------------------------------------------------------------
# Fused single-pass kernel (one image's full spatial extent resident in VMEM)
# ---------------------------------------------------------------------------
def _se_fused_kernel(x_ref, w1_ref, w2_ref, o_ref, *, hw_chunk, nchunks):
    # x_ref/o_ref: (nb, C, HW)   w1_ref: (C, Ce)   w2_ref: (Ce, C)
    nb, C, HW = x_ref.shape

    # --- Squeeze: chunked f32 accumulation over the lane-dense spatial axis ---
    if nchunks == 1:
        acc = jnp.sum(x_ref[...].astype(jnp.float32), axis=-1)          # (nb, C)
    else:
        def pool_body(i, acc):
            start = pl.multiple_of(i * hw_chunk, hw_chunk)
            chunk = x_ref[:, :, pl.ds(start, hw_chunk)]
            return acc + jnp.sum(chunk.astype(jnp.float32), axis=-1)
        acc = lax.fori_loop(0, nchunks, pool_body,
                            jnp.zeros((nb, C), jnp.float32),
                            unroll=(nchunks <= 4))
    pooled = acc * (1.0 / HW)                                            # (nb, C)

    # --- Excitation MLP: weights in storage dtype, f32 MXU accumulation ---
    h = jnp.maximum(
        jnp.dot(pooled.astype(w1_ref.dtype), w1_ref[...],
                preferred_element_type=jnp.float32), 0.0)                # (nb, Ce)
    gate = jax.nn.sigmoid(
        jnp.dot(h.astype(w2_ref.dtype), w2_ref[...],
                preferred_element_type=jnp.float32))                     # (nb, C)
    scale = gate.astype(o_ref.dtype)[:, :, None]                         # hoisted

    # --- Scale: re-read x chunk-wise; no full-block value stays live ---
    if nchunks == 1:
        o_ref[...] = (x_ref[...] * scale).astype(o_ref.dtype)
    else:
        @pl.loop(0, nchunks)
        def _(i):
            start = pl.multiple_of(i * hw_chunk, hw_chunk)
            sl = pl.ds(start, hw_chunk)
            o_ref[:, :, sl] = (x_ref[:, :, sl] * scale).astype(o_ref.dtype)


def _se_fused_call(x2, w1t, w2t, *, nb, hw_chunk, vmem_limit):
    N, C, HW = x2.shape
    Ce = w1t.shape[1]
    itemsize = x2.dtype.itemsize
    nchunks = HW // hw_chunk

    cost = pl.CostEstimate(
        flops=int(N * (4 * C * Ce + 2 * C * HW)),
        transcendentals=int(N * C),
        bytes_accessed=int(2 * N * C * HW * itemsize
                           + 2 * C * Ce * w1t.dtype.itemsize),
    )
    kernel = functools.partial(_se_fused_kernel, hw_chunk=hw_chunk, nchunks=nchunks)
    return pl.pallas_call(
        kernel,
        out_shape=jax.ShapeDtypeStruct((N, C, HW), x2.dtype),
        grid=(pl.cdiv(N, nb),),
        in_specs=[
            pl.BlockSpec((nb, C, HW), lambda n: (n, 0, 0)),
            pl.BlockSpec((C, Ce), lambda n: (0, 0)),
            pl.BlockSpec((Ce, C), lambda n: (0, 0)),
        ],
        out_specs=pl.BlockSpec((nb, C, HW), lambda n: (n, 0, 0)),
        compiler_params=pltpu.CompilerParams(
            dimension_semantics=("parallel",),
            vmem_limit_bytes=vmem_limit),
        cost_estimate=cost,
    )(x2, w1t, w2t)


# ---------------------------------------------------------------------------
# Two-pass fallback kernels (spatial axis tiled across the grid)
# ---------------------------------------------------------------------------
def _se_pool_excite_kernel(x_ref, w1_ref, w2_ref, scale_ref, acc_ref, *, hw_total):
    # x_ref: (nb, C, hwc)   scale_ref: (nb, C, 1)   acc_ref: (nb, C) f32 scratch
    s = pl.program_id(1)

    @pl.when(s == 0)
    def _():
        acc_ref[...] = jnp.zeros_like(acc_ref)

    # Mask lanes past the true spatial extent (ragged last chunk reads padding).
    hwc = x_ref.shape[-1]
    lane = lax.broadcasted_iota(jnp.int32, x_ref.shape, dimension=2)
    valid = (s * hwc + lane) < hw_total
    xc = jnp.where(valid, x_ref[...].astype(jnp.float32), 0.0)
    acc_ref[...] += jnp.sum(xc, axis=-1)

    @pl.when(s == pl.num_programs(1) - 1)
    def _():
        pooled = acc_ref[...] * (1.0 / hw_total)
        h = jnp.maximum(
            jnp.dot(pooled.astype(w1_ref.dtype), w1_ref[...],
                    preferred_element_type=jnp.float32), 0.0)
        gate = jax.nn.sigmoid(
            jnp.dot(h.astype(w2_ref.dtype), w2_ref[...],
                    preferred_element_type=jnp.float32))
        scale_ref[...] = gate.astype(scale_ref.dtype)[:, :, None]


def _se_scale_kernel(x_ref, scale_ref, o_ref):
    o_ref[...] = (x_ref[...] * scale_ref[...]).astype(o_ref.dtype)


def _se_two_pass_call(x2, w1t, w2t, *, nb, spatial_chunk, vmem_limit):
    N, C, HW = x2.shape
    Ce = w1t.shape[1]
    n_grid = pl.cdiv(N, nb)
    s_grid = pl.cdiv(HW, spatial_chunk)

    # Pass 1: squeeze (partial sums over spatial chunks) + excitation MLP -> gate.
    pool_kernel = functools.partial(_se_pool_excite_kernel, hw_total=HW)
    scale = pl.pallas_call(
        pool_kernel,
        out_shape=jax.ShapeDtypeStruct((N, C, 1), x2.dtype),
        grid=(n_grid, s_grid),
        in_specs=[
            pl.BlockSpec((nb, C, spatial_chunk), lambda n, s: (n, 0, s)),
            pl.BlockSpec((C, Ce), lambda n, s: (0, 0)),
            pl.BlockSpec((Ce, C), lambda n, s: (0, 0)),
        ],
        out_specs=pl.BlockSpec((nb, C, 1), lambda n, s: (n, 0, 0)),
        scratch_shapes=[pltpu.VMEM((nb, C), jnp.float32)],
        compiler_params=pltpu.CompilerParams(
            dimension_semantics=("parallel", "arbitrary"),
            vmem_limit_bytes=vmem_limit),
    )(x2, w1t, w2t)

    # Pass 2: broadcast the per-channel gate over the spatial axis.
    return pl.pallas_call(
        _se_scale_kernel,
        out_shape=jax.ShapeDtypeStruct((N, C, HW), x2.dtype),
        grid=(n_grid, s_grid),
        in_specs=[
            pl.BlockSpec((nb, C, spatial_chunk), lambda n, s: (n, 0, s)),
            pl.BlockSpec((nb, C, 1), lambda n, s: (n, 0, 0)),
        ],
        out_specs=pl.BlockSpec((nb, C, spatial_chunk), lambda n, s: (n, 0, s)),
        compiler_params=pltpu.CompilerParams(
            dimension_semantics=("parallel", "parallel"),
            vmem_limit_bytes=vmem_limit),
    )(x2, scale)


# ---------------------------------------------------------------------------
# Public wrapper
# ---------------------------------------------------------------------------
def se_layer(x, w_fc1, w_fc2, *, force_two_pass=False, spatial_chunk=None):
    """SELayer forward. x: (N, C, H, W); w_fc1: (Ce, C) = fc[0].weight; w_fc2: (C, Ce)."""
    N, C, H, W = x.shape
    HW = H * W
    Ce = w_fc1.shape[0]

    # Lane-dense spatial layout: kernels see (nb, C, H*W) blocks.
    # TODO(synk): add a C-on-lanes block layout for HW < 128 (e.g. 7x7 late-stage
    # SE) to avoid masked partial stores on the lane axis.
    x2 = x.reshape(N, C, HW)
    w1t = jnp.transpose(w_fc1)               # (C, Ce): channel = MXU contraction axis
    w2t = jnp.transpose(w_fc2)               # (Ce, C)

    vmem_cap, num_tc = _tpu_hw_params()
    # v5e/v6e (128 MiB VMEM) -> ~96 MiB ceiling; v7x (64 MiB) -> ~48 MiB ceiling.
    vmem_limit_cap = int(min((vmem_cap * 3) // 4, 96 << 20))
    itemsize = x.dtype.itemsize
    w_bytes = 2 * C * Ce * w_fc1.dtype.itemsize
    avail = max(vmem_limit_cap - w_bytes - (2 << 20), 4 << 20)

    hw_chunk = _pick_spatial_chunk(HW)
    per_image_io = C * HW * itemsize          # one x block + one out block each
    per_image_tmp = C * hw_chunk * 4          # f32 chunk temporaries in the kernel
    fused_per_image = 4 * per_image_io + per_image_tmp   # 2x double-buffered in + out

    if not force_two_pass and fused_per_image <= avail:
        nb = _pick_batch_block(N, avail // fused_per_image, num_tc >= 2)
        vmem_limit = int(min(max(nb * fused_per_image + w_bytes + (2 << 20),
                                 16 << 20), vmem_limit_cap))
        out2 = _se_fused_call(x2, w1t, w2t, nb=nb, hw_chunk=hw_chunk,
                              vmem_limit=vmem_limit)
    else:
        # Spatially tiled two-pass fallback: reads x twice, but never requires a
        # whole image's (C, H*W) slab to fit in VMEM.
        if spatial_chunk is None:
            spatial_chunk = max(128, (avail // (6 * C * itemsize)) // 128 * 128)
        spatial_chunk = min(spatial_chunk, HW)
        if HW < 128:
            spatial_chunk = HW
        nb = max(1, min(N, avail // (6 * C * spatial_chunk * itemsize)))
        nb = _pick_batch_block(N, nb, num_tc >= 2)
        vmem_limit = int(min(max(6 * nb * C * spatial_chunk * itemsize
                                 + w_bytes + (2 << 20), 16 << 20),
                             vmem_limit_cap))
        out2 = _se_two_pass_call(x2, w1t, w2t, nb=nb, spatial_chunk=spatial_chunk,
                                 vmem_limit=vmem_limit)
    return out2.reshape(N, C, H, W)


def se_layer_ref(x, w_fc1, w_fc2):
    """Pure-JAX reference for correctness checking."""
    x32 = x.astype(jnp.float32)
    y = jnp.mean(x32, axis=(2, 3))                                   # (N, C)
    h = jnp.maximum(y @ w_fc1.astype(jnp.float32).T, 0.0)            # (N, Ce)
    s = jax.nn.sigmoid(h @ w_fc2.astype(jnp.float32).T)              # (N, C)
    return x32 * s[:, :, None, None]


if __name__ == "__main__":
    # Small shapes consistent with the module: channel=16, reduction=4 -> Ce=64.
    N, C, H, W, reduction = 2, 16, 16, 16, 4
    Ce = C * reduction

    key = jax.random.PRNGKey(0)
    kx, k1, k2 = jax.random.split(key, 3)

    x = jax.random.normal(kx, (N, C, H, W), dtype=jnp.float32)
    # PyTorch Linear weights are (out_features, in_features), bias-free.
    w_fc1 = jax.random.normal(k1, (Ce, C), dtype=jnp.float32) * 0.1
    w_fc2 = jax.random.normal(k2, (C, Ce), dtype=jnp.float32) * 0.1

    ref = jax.block_until_ready(se_layer_ref(x, w_fc1, w_fc2))

    # Primary fused path.
    out = jax.block_until_ready(se_layer(x, w_fc1, w_fc2))
    assert out.shape == (N, C, H, W)
    assert jnp.allclose(out, ref, atol=1e-5, rtol=1e-5), (
        f"fused path: max abs err {jnp.max(jnp.abs(out - ref))}")

    # Exercise the spatially tiled two-pass fallback (used when a single image's
    # (C, H*W) slab exceeds the per-block VMEM budget).
    out2 = jax.block_until_ready(
        se_layer(x, w_fc1, w_fc2, force_two_pass=True, spatial_chunk=128))
    assert jnp.allclose(out2, ref, atol=1e-5, rtol=1e-5), (
        f"two-pass path: max abs err {jnp.max(jnp.abs(out2 - ref))}")

    print("KERNEL_OK")
</pallas_src>

<mosaic_0001>
module attributes {stable_mosaic.version = 11 : i64} {
  func.func @_se_fused_kernel(%arg0: i32, %arg1: memref<2x16x256xf32, #tpu.memory_space<vmem>>, %arg2: memref<16x64xf32, #tpu.memory_space<vmem>>, %arg3: memref<64x16xf32, #tpu.memory_space<vmem>>, %arg4: memref<2x16x256xf32, #tpu.memory_space<vmem>>) attributes {dimension_semantics = [#tpu.dimension_semantics<parallel>], iteration_bounds = array<i64: 1>, scalar_prefetch = 0 : i64, scratch_operands = 0 : i64, tpu.core_type = #tpu.core_type<tc>, window_params = [{transform_indices = @transform_0, window_bounds = array<i64: 2, 16, 256>}, {pipeline_mode = #tpu.pipeline_mode<synchronous>, transform_indices = @transform_1, window_bounds = array<i64: 16, 64>}, {pipeline_mode = #tpu.pipeline_mode<synchronous>, transform_indices = @transform_2, window_bounds = array<i64: 64, 16>}, {transform_indices = @transform_3, window_bounds = array<i64: 2, 16, 256>}]} {
    %c0 = arith.constant 0 : index
    %c0_0 = arith.constant 0 : index
    %c0_1 = arith.constant 0 : index
    %0 = vector.load %arg1[%c0, %c0_0, %c0_1] : memref<2x16x256xf32, #tpu.memory_space<vmem>>, vector<2x16x256xf32>
    %cst = arith.constant dense<0.000000e+00> : vector<2x16xf32>
    %1 = vector.multi_reduction <add>, %0, %cst [2] : vector<2x16x256xf32> to vector<2x16xf32>
    %cst_2 = arith.constant 3.906250e-03 : f32
    %2 = vector.broadcast %cst_2 : f32 to vector<2x16xf32>
    %3 = arith.mulf %1, %2 : vector<2x16xf32>
    %c0_3 = arith.constant 0 : index
    %c0_4 = arith.constant 0 : index
    %4 = vector.load %arg2[%c0_3, %c0_4] : memref<16x64xf32, #tpu.memory_space<vmem>>, vector<16x64xf32>
    %cst_5 = arith.constant dense<0.000000e+00> : vector<2x64xf32>
    %5 = tpu.matmul %3, %4, %cst_5 {dimension_numbers = #tpu.dot_dimension_numbers<[1], [0], [0], [1], [0, 0, 1, 1], [], []>} : vector<2x16xf32>, vector<16x64xf32>, vector<2x64xf32> -> vector<2x64xf32>
    %cst_6 = arith.constant 0.000000e+00 : f32
    %6 = vector.broadcast %cst_6 : f32 to vector<2x64xf32>
    %7 = arith.maximumf %5, %6 : vector<2x64xf32>
    %c0_7 = arith.constant 0 : index
    %c0_8 = arith.constant 0 : index
    %8 = vector.load %arg3[%c0_7, %c0_8] : memref<64x16xf32, #tpu.memory_space<vmem>>, vector<64x16xf32>
    %cst_9 = arith.constant dense<0.000000e+00> : vector<2x16xf32>
    %9 = tpu.matmul %7, %8, %cst_9 {dimension_numbers = #tpu.dot_dimension_numbers<[1], [0], [0], [1], [0, 0, 1, 1], [], []>} : vector<2x64xf32>, vector<64x16xf32>, vector<2x16xf32> -> vector<2x16xf32>
    %10 = arith.negf %9 : vector<2x16xf32>
    %11 = math.exp %10 : vector<2x16xf32>
    %cst_10 = arith.constant 1.000000e+00 : f32
    %12 = vector.broadcast %cst_10 : f32 to vector<2x16xf32>
    %13 = arith.addf %12, %11 : vector<2x16xf32>
    %14 = arith.divf %12, %13 : vector<2x16xf32>
    %15 = vector.shape_cast %14 : vector<2x16xf32> to vector<2x16x1xf32>
    %c0_11 = arith.constant 0 : index
    %c0_12 = arith.constant 0 : index
    %c0_13 = arith.constant 0 : index
    %16 = vector.load %arg1[%c0_11, %c0_12, %c0_13] : memref<2x16x256xf32, #tpu.memory_space<vmem>>, vector<2x16x256xf32>
    %17 = vector.broadcast %15 : vector<2x16x1xf32> to vector<2x16x256xf32>
    %18 = arith.mulf %16, %17 : vector<2x16x256xf32>
    %c0_14 = arith.constant 0 : index
    %c0_15 = arith.constant 0 : index
    %c0_16 = arith.constant 0 : index
    %19 = vector.load %arg4[%c0_14, %c0_15, %c0_16] : memref<2x16x256xf32, #tpu.memory_space<vmem>>, vector<2x16x256xf32>
    tpu.vector_store %arg4[%c0_14, %c0_15, %c0_16], %18 {strides = array<i32>} : memref<2x16x256xf32, #tpu.memory_space<vmem>>, vector<2x16x256xf32>,
    return
  }
  func.func @transform_0(%arg0: i32) -> (i32, i32, i32) {
    %c0_i32 = arith.constant 0 : i32
    %c0_i32_0 = arith.constant 0 : i32
    %c0_i32_1 = arith.constant 0 : i32
    return %arg0, %c0_i32, %c0_i32_0 : i32, i32, i32
  }
  func.func @transform_1(%arg0: i32) -> (i32, i32) {
    %c0_i32 = arith.constant 0 : i32
    %c0_i32_0 = arith.constant 0 : i32
    %c0_i32_1 = arith.constant 0 : i32
    return %c0_i32, %c0_i32_0 : i32, i32
  }
  func.func @transform_2(%arg0: i32) -> (i32, i32) {
    %c0_i32 = arith.constant 0 : i32
    %c0_i32_0 = arith.constant 0 : i32
    %c0_i32_1 = arith.constant 0 : i32
    return %c0_i32, %c0_i32_0 : i32, i32
  }
  func.func @transform_3(%arg0: i32) -> (i32, i32, i32) {
    %c0_i32 = arith.constant 0 : i32
    %c0_i32_0 = arith.constant 0 : i32
    %c0_i32_1 = arith.constant 0 : i32
    return %arg0, %c0_i32, %c0_i32_0 : i32, i32, i32
  }
}

</mosaic_0001>

<bundles_post_ra>
// kernel: tpu_custom_call.1
= control target key start
LH: loop header
LB: loop body
LE: loop exit
PB: predicated region body
PF: predicated region fallthrough
CT: control target
= control target key end

     0   :  { %s471_s0 = inlined_call_operand.vmem [shape: f32[2,16,256], index: 0, kind: input, shape index: {}]   ;;  %s472_s1 = inlined_call_operand.vmem [shape: f32[16,64], index: 1, kind: input, shape index: {}]   ;;  %s473_s2 = inlined_call_operand.vmem [shape: f32[64,16], index: 2, kind: input, shape index: {}]   ;;  %s474_s3 = inlined_call_operand.hbm [shape: f32[2,16,256], index: 3, kind: output, shape index: {}]  }
   0x1   :  { %v385_v0 = vld [vmem:[%s471_s0 + $0x20] sm:$0xff]  ;;  %v390_v1 = vld [vmem:[%s471_s0 + $0x28] sm:$0xff]  ;;  %v407_v5 = vld [vmem:[%s471_s0 + $0x30] sm:$0xff] }
   0x2   :  { %v395_v2 = vld [vmem:[%s471_s0] sm:$0xff]  ;;  %v29_v3 = vadd.f32 %v390_v1, %v385_v0  ;;  %v402_v4 = vld [vmem:[%s471_s0 + $0x8] sm:$0xff]  ;;  %v412_v6 = vld [vmem:[%s471_s0 + $0x38] sm:$0xff] }
   0x3   :  { %v23_v7 = vadd.f32 %v402_v4, %v395_v2  ;;  %v419_v8 = vld [vmem:[%s471_s0 + $0x10] sm:$0xff]  ;;  %v424_v9 = vld [vmem:[%s471_s0 + $0x18] sm:$0xff] }
   0x4   :  { %8 = vsyncpa [#allocation3], 0  ;;  %30 = vadd.xlane.f32.xlu1 %v29_v3  ;;  %v32_v10 = vadd.f32 %v412_v6, %v407_v5  ;;  %v26_v11 = vadd.f32 %v424_v9, %v419_v8  ;;  %v357_v12 = vmov 0.0   ;;  %v40_v13 = vld [vmem:[%s472_s1 + $0x8] sm:$0xff]  ;;  %v39_v14 = vld [vmem:[%s472_s1] sm:$0xff]  ;;  %vm358_vm0 = vmmov 0  }
   0x5   :  { %24 = vadd.xlane.f32.xlu0 %v23_v7  ;;  %300 = vmatprep.subr.mxu0 %v357_v12  ;;  %v150_v15 = vld [vmem:[%s473_s2 + $0x38] sm:$0xff]  ;;  %v149_v16 = vld [vmem:[%s473_s2 + $0x30] sm:$0xff]  ;;  %v148_v17 = vld [vmem:[%s473_s2 + $0x28] sm:$0xff]  ;;  %v45_v21 = vlaneseq  ;;  %vm56_vm1 = vcmask 130112   ;;  %vm67_vm2 = vcmask 1041409   ;;  %vm69_vm3 = vcmask 130048  }
   0x6   :  { %307 = vmatprep.subr.mxu1 %v357_v12  ;;  %301 = vmatpush3.msra.mxu0 %v40_v13  ;;  %v147_v18 = vld [vmem:[%s473_s2 + $0x20] sm:$0xff]  ;;  %v146_v19 = vld [vmem:[%s473_s2 + $0x18] sm:$0xff]  ;;  %v145_v20 = vld [vmem:[%s473_s2 + $0x10] sm:$0xff]  ;;  %vm151_vm4 = vcmask 523264  }
   0x7   :  { %304 = vmatprep.mubr.msk.f32.mxu0 %vm358_vm0, %v357_v12  ;;  %302 = vmatprep.subr.mxu0 %v357_v12  ;;  %v46_v22 = vand.u32 127, %v45_v21  ;;  %v48_v23 = vshrl.u32 %v45_v21, 7  ;;  %v144_v42 = vld [vmem:[%s473_s2 + $0x8] sm:$0xff]  ;;  %v143_v43 = vld [vmem:[%s473_s2] sm:$0xff]  ;;  %s359_s2 = smov [#allocation2]  }
   0x8   :  { %33 = vadd.xlane.f32.xlu1 %v32_v10  ;;  %323 = vmatprep.mubr.msk.f32.mxu1 %vm358_vm0, %v357_v12  ;;  %s274_s19 = sshll.u32 %s359_s2, 4  ;;  %s275_s19 = int_to_ptr.vmem [resolvable:$true] %s274_s19 }
   0x9   :  { %27 = vadd.xlane.f32.xlu0 %v26_v11  ;;  %303 = vmatpush3.msra.mxu0 %v39_v14  ;;  %v51_v24 = vadd.s32 4294967288, %v46_v22  ;;  %v49_v27 = vsub.s32 %v46_v22, %v48_v23  ;;  %v233_v52 = vsub.s32 0, %v48_v23  ;;  %v244_v55 = vsub.s32 1, %v48_v23  ;;  %s335_s20 = scalar_lea.vmem %s275_s19, 1024  ;;  %p340_p1 = scmp.lt.s32.totalorder %s275_s19, %s275_s19 }
   0xa   :  { %308 = vmatpush3.msra.mxu1 %v150_v15  ;;  %p336_p0 = scmp.ne.s32.totalorder %s275_s19, %s335_s20  ;;  %p341_p2 = scmp.lt.s32.totalorder %s335_s20, %s335_s20 }
   0xb   :  { %309 = vmatprep.subr.mxu1 %v357_v12  ;;  %v54_v29 = vsub.s32 %v51_v24, %v48_v23 }
   0xc   :  { %310 = vmatpush3.msra.mxu1 %v149_v16  ;;  %p342_p3 = por %p341_p2, %p340_p1 }
   0xd   :  { %311 = vmatprep.subr.mxu1 %v357_v12 }
   0xe   :  { %312 = vmatpush3.msra.mxu1 %v148_v17  ;;  %p343_p4 = pnand %p342_p3, %p336_p0 }
   0xf   :  { %313 = vmatprep.subr.mxu1 %v357_v12 }
  0x10   :  { %314 = vmatpush3.msra.mxu1 %v147_v18 }
  0x11   :  { %315 = vmatprep.subr.mxu1 %v357_v12 }
  0x12   :  { %316 = vmatpush3.msra.mxu1 %v146_v19 }
  0x13   :  { %317 = vmatprep.subr.mxu1 %v357_v12 }
  0x14   :  { %318 = vmatpush3.msra.mxu1 %v145_v20 }
  0x15   :  { %319 = vmatprep.subr.mxu1 %v357_v12 }
  0x16   :  { %320 = vmatpush3.msra.mxu1 %v144_v42 }
  0x17   :  { %321 = vmatprep.subr.mxu1 %v357_v12 }
  0x18   :  { %322 = vmatpush3.msra.mxu1 %v143_v43 }
  0x8d   :  { %v31_v25 = vpop.xlane.xlu1 %30 }
  0x8e   :  { %v25_v26 = vpop.xlane.xlu0 %24  ;;  %v37_v28 = vmul.f32 0.00390625, %v31_v25 }
  0x8f   :  { %v35_v30 = vmul.f32 0.00390625, %v25_v26 }
  0x90   :  { %v61_v35 = vrot.slane %v37_v28, %v49_v27 }
  0x91   :  { %v34_v31 = vpop.xlane.xlu1 %33  ;;  %v50_v37 = vrot.slane %v35_v30, %v49_v27 }
  0x92   :  { %v38_v32 = vmul.f32 0.00390625, %v34_v31  ;;  %v28_v33 = vpop.xlane.xlu0 %27 }
  0x93   :  { %v36_v34 = vmul.f32 0.00390625, %v28_v33 }
  0x94   :  { %v65_v36 = vrot.slane %v38_v32, %v54_v29 }
  0x95   :  { %v55_v38 = vrot.slane %v36_v34, %v54_v29 }
  0x96   :  { %v66_v39 = vsel %vm56_vm1, %v65_v36, %v61_v35 }
  0x97   :  { %v57_v40 = vsel %vm56_vm1, %v55_v38, %v50_v37 }
  0x98   :  { %v68_v41 = vsel %vm67_vm2, %v66_v39, %v57_v40 }
  0x99   :  { %305 = vmatmul.mubr.msk.f32.vlgmr.msra.gmra.mxu0 %vm69_vm3, %v68_v41 }
 0x159   :  { %v138_v44 = vpop.f32.mrf.mxu0 }
 0x15a   :  { %v142_v45 = vmax.f32 %v138_v44, 0.0 }
 0x15b   :  { %v306_v46 = vpop.f32.mrf.mxu0 }
 0x15c   :  { %324 = vmatmul.mubr.msk.f32.vlgmr.msra.gmra.mxu1 %vm151_vm4, %v142_v45 }
 0x21c   :  { %v221_v47 = vpop.f32.mrf.mxu1 }
 0x21d   :  { %v287_v48 = vmul.f32 -1.442695, %v221_v47 }
 0x21e   :  { %v325_v49 = vpop.f32.mrf.mxu1 }
 0x21f   :  { %331 = vpow2.f32 %v287_v48 }
 0x22c   :  { %v332_v50 = vpop.eup %331 }
 0x22d   :  { %v228_v51 = vadd.f32 1.0, %v332_v50 }
 0x22f   :  { %333 = vrcp.f32 %v228_v51 }
 0x23c   :  { %v334_v53 = vpop.eup %333 }
 0x23d   :  { %v234_v54 = vrot.slane %v334_v53, %v233_v52  ;;  %v245_v56 = vrot.slane %v334_v53, %v244_v55 }
 0x23f   :  { %240 = vbcast.lane.b32.xlu1 %v234_v54, 264  ;;  %236 = vbcast.lane.b32.xlu0 %v234_v54, 256 }
 0x243   :  { %247 = vbcast.lane.b32.xlu1 %v245_v56, 256 }
 0x247   :  { %251 = vbcast.lane.b32.xlu1 %v245_v56, 264 }
 0x2b1   :  { %v241_v57 = vpop.permute.xlu1 %240  ;;  %v237_v58 = vpop.permute.xlu0 %236 }
 0x2b2   :  { %v255_v59 = vmul.f32 %v241_v57, %v419_v8  ;;  %v256_v60 = vmul.f32 %v241_v57, %v424_v9  ;;  %v253_v61 = vmul.f32 %v237_v58, %v395_v2  ;;  %v254_v62 = vmul.f32 %v237_v58, %v402_v4 }
 0x2b4   :  { %263 = vst [vmem:[#allocation2 + $0x10] sm:$0xff] %v255_v59  ;;  %264 = vst [vmem:[#allocation2 + $0x18] sm:$0xff] %v256_v60 }
 0x2b5   :  { %261 = vst [vmem:[#allocation2] sm:$0xff] %v253_v61  ;;  %262 = vst [vmem:[#allocation2 + $0x8] sm:$0xff] %v254_v62  ;;  %v248_v63 = vpop.permute.xlu1 %247 }
 0x2b6   :  { %v257_v3 = vmul.f32 %v248_v63, %v385_v0  ;;  %v258_v7 = vmul.f32 %v248_v63, %v390_v1 }
 0x2b8   :  { %265 = vst [vmem:[#allocation2 + $0x20] sm:$0xff] %v257_v3  ;;  %266 = vst [vmem:[#allocation2 + $0x28] sm:$0xff] %v258_v7 }
 0x2b9   :  { %v252_v8 = vpop.permute.xlu1 %251 }
 0x2ba   :  { %v259_v9 = vmul.f32 %v252_v8, %v407_v5  ;;  %v260_v2 = vmul.f32 %v252_v8, %v412_v6 }
 0x2bc   :  { %267 = vst [vmem:[#allocation2 + $0x30] sm:$0xff] %v259_v9  ;;  %268 = vst [vmem:[#allocation2 + $0x38] sm:$0xff] %v260_v2 }
 0x2bd   :  { %346 = shalt.err (!%p343_p4)
}
 0x2be   :  { %s360_s21 = smov 256   ;;  %s361_s22 = smov 16  }
 0x2bf   :  { %280 = dma.vmem_to_hbm [thread:$0]  %s275_s19, 1024, %s474_s3, [#allocation3], %s360_s21, %s360_s21, %s361_s22  }
 0x2c0   :  { %355 = dma.done.wait [#allocation3], 1024  }
 0x2c1   :  { %356 = vsyncadd [#allocation3], 4294966272 }
 0x2c2   :  { %284 = vsyncpa [#allocation3], 1 }

</bundles_post_ra>
